<compile_context>
chip_gen: v7x
topology: tpu7x:2x2x1
jax: 0.10.0
libtpu: 0.0.40
codegen_flags: <defaults>
</compile_context>

<pallas_src>
import functools

import jax
import jax.numpy as jnp
from jax import lax
from jax.experimental import pallas as pl
from jax.experimental.pallas import tpu as pltpu


def _round_up(x, m):
    return ((x + m - 1) // m) * m


def _make_kernel(n_dec, compute_dtype, wo_k_major):
    """Kernel for `n_dec` decoder outputs (concat fused as a sum of matmuls)."""

    def kernel(*refs):
        x_refs = refs[:n_dec]                      # each [Mt, D_i]  (original dtype)
        wb_refs = refs[n_dec:2 * n_dec]            # each [dim, D_i] (compute dtype)
        bb_ref, wo_ref, bo_ref, out_ref, hid_ref = refs[2 * n_dec:]

        # Bottleneck hidden: computed once per M-tile (first vocab tile only) into
        # an f32 VMEM scratch and reused across vocab tiles (inner axis "arbitrary").
        @pl.when(pl.program_id(1) == 0)
        def _():
            acc = lax.dot_general(
                x_refs[0][...].astype(compute_dtype), wb_refs[0][...],
                dimension_numbers=(((1,), (1,)), ((), ())),
                preferred_element_type=jnp.float32)
            for i in range(1, n_dec):
                acc = acc + lax.dot_general(
                    x_refs[i][...].astype(compute_dtype), wb_refs[i][...],
                    dimension_numbers=(((1,), (1,)), ((), ())),
                    preferred_element_type=jnp.float32)
            hid_ref[...] = acc + bb_ref[...]

        hid = hid_ref[...].astype(compute_dtype)
        if wo_k_major:
            # wo tile is [dim, Vt]: lane axis = Vt (dense), native K-major RHS.
            logits = lax.dot_general(
                hid, wo_ref[...],
                dimension_numbers=(((1,), (0,)), ((), ())),
                preferred_element_type=jnp.float32)
        else:
            # wo tile is [Vt, dim] (PyTorch layout), contract against its minor dim.
            logits = lax.dot_general(
                hid, wo_ref[...],
                dimension_numbers=(((1,), (1,)), ((), ())),
                preferred_element_type=jnp.float32)
        out_ref[...] = (logits + bo_ref[...]).astype(out_ref.dtype)

    return kernel


@functools.partial(
    jax.jit,
    static_argnames=("m_tile", "vocab_tile", "out_dtype", "compute_dtype",
                     "min_m_tiles"))
def bottleneck_strategy_forward(unprojected_outs, wb, bb, wo, bo,
                                m_tile=512, vocab_tile=1024,
                                out_dtype=jnp.float32,
                                compute_dtype=jnp.bfloat16,
                                min_m_tiles=1):
    """Fused (concat -> bottleneck Linear -> output projection).

    Args:
      unprojected_outs: list of [B, T, D_i] arrays.
      wb: bottleneck weight, PyTorch layout [dim, sum(D_i)].
      bb: bottleneck bias, [dim].
      wo: output projection weight, PyTorch layout [vocab, dim].
      bo: output projection bias, [vocab].
      m_tile / vocab_tile: tile sizes (M tile multiple of 8, vocab tile of 128;
        prefer multiples of 256 for the v6e/v7x MXU).
      out_dtype: logits dtype (f32 matches the module; bf16 halves logits HBM
        traffic when downstream tolerates it).
      min_m_tiles: set to 2 on v7x for decode-shaped inputs so both TensorCores
        get an M tile on the "parallel" axis.

    Returns:
      (logits [B, T, vocab] in out_dtype, possible_translation_tokens=None)
    """
    assert m_tile % 8 == 0 and vocab_tile % 128 == 0

    n_dec = len(unprojected_outs)
    B, T, _ = unprojected_outs[0].shape
    M = B * T
    dims = [int(u.shape[2]) for u in unprojected_outs]
    Dsum = sum(dims)
    dim = int(wb.shape[0])
    vocab = int(wo.shape[0])

    # Tile sizes (respect (8,128) layout granularity, bound VMEM per grid step).
    Mt = min(m_tile, _round_up(M, 8))
    if min_m_tiles > 1:                       # v7x megacore: force >= min_m_tiles M tiles
        Mt = min(Mt, _round_up(-(-M // min_m_tiles), 8))
    Vt = min(vocab_tile, _round_up(vocab, 128))
    M_pad = _round_up(M, Mt)
    V_pad = _round_up(vocab, Vt)
    m_tiles = M_pad // Mt
    v_tiles = V_pad // Vt

    # Activations: flatten batch*time, keep original dtype (cast to the MXU compute
    # dtype inside the kernel), pad M only if needed.
    xs = []
    for u in unprojected_outs:
        x2d = u.reshape(M, u.shape[2])
        if M_pad != M:
            x2d = jnp.pad(x2d, ((0, M_pad - M), (0, 0)))
        xs.append(x2d)

    # Split the bottleneck weight per decoder so the concat is fused into the kernel
    # (weight-sized slices only; no [M, Dsum] concat buffer through HBM).
    wb_c = wb.astype(compute_dtype)
    wb_parts = []
    off = 0
    for d in dims:
        wb_parts.append(wb_c[:, off:off + d])
        off += d

    bb2 = bb.reshape(1, dim).astype(jnp.float32)
    bo2 = bo.reshape(1, vocab).astype(jnp.float32)
    if V_pad != vocab:
        bo2 = jnp.pad(bo2, ((0, 0), (0, V_pad - vocab)))

    # Output-projection weight layout: keep the lane axis dense.  If dim is a
    # multiple of 128 the PyTorch [vocab, dim] layout is already lane-dense; if
    # not, transpose once to [dim, vocab] so the lane axis is the vocab tile.
    wo_c = wo.astype(compute_dtype)
    wo_k_major = (dim % 128 != 0)
    if wo_k_major:
        wo_c = wo_c.T                                             # [dim, vocab]
        if V_pad != vocab:
            wo_c = jnp.pad(wo_c, ((0, 0), (0, V_pad - vocab)))
        wo_spec = pl.BlockSpec((dim, Vt), lambda i, j: (0, j))
    else:
        if V_pad != vocab:
            wo_c = jnp.pad(wo_c, ((0, V_pad - vocab), (0, 0)))
        wo_spec = pl.BlockSpec((Vt, dim), lambda i, j: (j, 0))

    # Grid: M outermost ("parallel", v7x megacore); vocab innermost ("arbitrary"
    # because the hidden scratch is carried across its steps).
    grid = (m_tiles, v_tiles)

    single_buf = pl.Buffered(1)   # grid-invariant weights: no 2nd pipeline buffer
    in_specs = (
        [pl.BlockSpec((Mt, d), lambda i, j: (i, 0)) for d in dims]          # x_i
        + [pl.BlockSpec((dim, d), lambda i, j: (0, 0), pipeline_mode=single_buf)
           for d in dims]                                                   # wb_i
        + [pl.BlockSpec((1, dim), lambda i, j: (0, 0), pipeline_mode=single_buf),  # bb
           wo_spec,                                                          # wo tile
           pl.BlockSpec((1, Vt), lambda i, j: (0, j))]                       # bo tile
    )
    out_spec = pl.BlockSpec((Mt, Vt), lambda i, j: (i, j))

    bpe = jnp.dtype(compute_dtype).itemsize
    xbe = jnp.dtype(unprojected_outs[0].dtype).itemsize
    obe = jnp.dtype(out_dtype).itemsize
    cost = pl.CostEstimate(
        flops=2 * M * (Dsum * dim + dim * vocab),
        transcendentals=0,
        bytes_accessed=int(
            M_pad * Dsum * xbe                                # x, once per M tile
            + dim * Dsum * bpe + dim * 4                      # wb parts + bb, once
            + m_tiles * (V_pad * dim * bpe + V_pad * 4)       # wo + bo per M tile
            + M_pad * V_pad * obe),                           # logits write
    )

    # VMEM budget for the chosen tiles (double-buffered streaming operands,
    # single-buffered invariant weights, resident f32 hidden scratch) with
    # headroom; cap at ~75% of this generation's physical per-core VMEM.
    vmem_est = (2 * Mt * Dsum * xbe          # x tiles
                + dim * Dsum * bpe           # wb parts (single-buffered)
                + dim * 4                    # bb (single-buffered)
                + 2 * Vt * dim * bpe         # wo tile
                + 2 * Vt * 4                 # bo tile
                + 2 * Mt * Vt * obe          # out tile
                + Mt * dim * 4)              # f32 hidden scratch
    try:
        vmem_cap = int(pltpu.get_tpu_info().vmem_capacity_bytes)
    except Exception:
        vmem_cap = 64 * 1024 * 1024          # conservative (v7x per-TensorCore)
    vmem_limit = int(min(max(int(1.5 * vmem_est), 32 * 1024 * 1024),
                         (3 * vmem_cap) // 4))

    logits2d = pl.pallas_call(
        _make_kernel(n_dec, compute_dtype, wo_k_major),
        out_shape=jax.ShapeDtypeStruct((M_pad, V_pad), out_dtype),
        grid_spec=pltpu.PrefetchScalarGridSpec(
            num_scalar_prefetch=0,
            grid=grid,
            in_specs=in_specs,
            out_specs=out_spec,
            scratch_shapes=[pltpu.VMEM((Mt, dim), jnp.float32)],   # hidden (f32)
        ),
        compiler_params=pltpu.CompilerParams(
            dimension_semantics=("parallel", "arbitrary"),
            vmem_limit_bytes=vmem_limit,
        ),
        cost_estimate=cost,
    )(*xs, *wb_parts, bb2, wo_c, bo2)

    if M_pad != M or V_pad != vocab:
        logits2d = logits2d[:M, :vocab]
    logits = logits2d.reshape(B, T, vocab)
    # TODO(synk): vocab_reduction_module path (possible_translation_tokens gather) not implemented.
    return logits, None


def _reference(unprojected_outs, wb, bb, wo, bo):
    x = jnp.concatenate(unprojected_outs, axis=2)
    h = jnp.einsum("btd,od->bto", x, wb) + bb
    logits = jnp.einsum("bto,vo->btv", h, wo) + bo
    return logits


if __name__ == "__main__":
    key = jax.random.PRNGKey(0)

    # Small shapes consistent with the module: two decoders, equal embed dims.
    B, T = 2, 8
    out_embed_dims = [32, 32]
    dim = out_embed_dims[0]
    Dsum = sum(out_embed_dims)
    vocab = 256

    keys = jax.random.split(key, 6)
    unprojected_outs = [
        jax.random.normal(keys[0], (B, T, out_embed_dims[0]), dtype=jnp.float32),
        jax.random.normal(keys[1], (B, T, out_embed_dims[1]), dtype=jnp.float32),
    ]
    # Deterministic synthetic parameters (PyTorch layouts [out, in] / [out]).
    wb = 0.1 * jax.random.normal(keys[2], (dim, Dsum), dtype=jnp.float32)
    bb = 0.01 * jax.random.normal(keys[3], (dim,), dtype=jnp.float32)
    wo = jax.random.uniform(keys[4], (vocab, dim), minval=-0.1, maxval=0.1,
                            dtype=jnp.float32)
    bo = 0.01 * jax.random.normal(keys[5], (vocab,), dtype=jnp.float32)

    ref = _reference(unprojected_outs, wb, bb, wo, bo)

    # 1) Default (large-tile) configuration: single grid step at these small shapes.
    logits, ptt = bottleneck_strategy_forward(unprojected_outs, wb, bb, wo, bo)
    jax.block_until_ready(logits)
    assert logits.shape == (B, T, vocab)
    assert ptt is None
    err = float(jnp.max(jnp.abs(logits.astype(jnp.float32) - ref)))
    assert jnp.allclose(logits.astype(jnp.float32), ref, atol=5e-2, rtol=5e-2), (
        f"default-tile mismatch vs reference, max abs err = {err}")

    # 2) Small-tile configuration: exercises the 2-D grid, the pl.when hidden
    #    recompute/reuse across vocab tiles, and the single-buffered weights.
    logits2, ptt2 = bottleneck_strategy_forward(
        unprojected_outs, wb, bb, wo, bo, m_tile=8, vocab_tile=128)
    jax.block_until_ready(logits2)
    assert logits2.shape == (B, T, vocab)
    assert ptt2 is None
    err2 = float(jnp.max(jnp.abs(logits2.astype(jnp.float32) - ref)))
    assert jnp.allclose(logits2.astype(jnp.float32), ref, atol=5e-2, rtol=5e-2), (
        f"small-tile mismatch vs reference, max abs err = {err2}")

    print("KERNEL_OK")
</pallas_src>

<mosaic_0001>
module attributes {stable_mosaic.version = 11 : i64} {
  func.func @kernel(%arg0: i32, %arg1: i32, %arg2: memref<16x32xf32, #tpu.memory_space<vmem>>, %arg3: memref<16x32xf32, #tpu.memory_space<vmem>>, %arg4: memref<32x32xbf16, #tpu.memory_space<vmem>>, %arg5: memref<32x32xbf16, #tpu.memory_space<vmem>>, %arg6: memref<1x32xf32, #tpu.memory_space<vmem>>, %arg7: memref<32x256xbf16, #tpu.memory_space<vmem>>, %arg8: memref<1x256xf32, #tpu.memory_space<vmem>>, %arg9: memref<16x256xf32, #tpu.memory_space<vmem>>, %arg10: memref<16x32xf32, #tpu.memory_space<vmem>>) attributes {dimension_semantics = [#tpu.dimension_semantics<parallel>, #tpu.dimension_semantics<arbitrary>], iteration_bounds = array<i64: 1, 1>, scalar_prefetch = 0 : i64, scratch_operands = 1 : i64, tpu.core_type = #tpu.core_type<tc>, window_params = [{transform_indices = @transform_0, window_bounds = array<i64: 16, 32>}, {transform_indices = @transform_1, window_bounds = array<i64: 16, 32>}, {pipeline_mode = #tpu.pipeline_mode<synchronous>, transform_indices = @transform_2, window_bounds = array<i64: 32, 32>}, {pipeline_mode = #tpu.pipeline_mode<synchronous>, transform_indices = @transform_3, window_bounds = array<i64: 32, 32>}, {pipeline_mode = #tpu.pipeline_mode<synchronous>, transform_indices = @transform_4, window_bounds = array<i64: 1, 32>}, {transform_indices = @transform_5, window_bounds = array<i64: 32, 256>}, {transform_indices = @transform_6, window_bounds = array<i64: 1, 256>}, {transform_indices = @transform_7, window_bounds = array<i64: 16, 256>}]} {
    %c0_i32 = arith.constant 0 : i32
    %0 = arith.cmpi eq, %arg1, %c0_i32 : i32
    %1 = arith.extui %0 : i1 to i32
    %c0_i32_0 = arith.constant 0 : i32
    %2 = arith.cmpi ne, %1, %c0_i32_0 : i32
    scf.if %2 {
      %c0_8 = arith.constant 0 : index
      %c0_9 = arith.constant 0 : index
      %11 = vector.load %arg2[%c0_8, %c0_9] : memref<16x32xf32, #tpu.memory_space<vmem>>, vector<16x32xf32>
      %12 = arith.truncf %11 : vector<16x32xf32> to vector<16x32xbf16>
      %c0_10 = arith.constant 0 : index
      %c0_11 = arith.constant 0 : index
      %13 = vector.load %arg4[%c0_10, %c0_11] : memref<32x32xbf16, #tpu.memory_space<vmem>>, vector<32x32xbf16>
      %cst_12 = arith.constant dense<0.000000e+00> : vector<16x32xf32>
      %14 = tpu.matmul %12, %13, %cst_12 {dimension_numbers = #tpu.dot_dimension_numbers<[1], [1], [0], [0], [0, 0, 1, 0], [], []>} : vector<16x32xbf16>, vector<32x32xbf16>, vector<16x32xf32> -> vector<16x32xf32>
      %c0_13 = arith.constant 0 : index
      %c0_14 = arith.constant 0 : index
      %15 = vector.load %arg3[%c0_13, %c0_14] : memref<16x32xf32, #tpu.memory_space<vmem>>, vector<16x32xf32>
      %16 = arith.truncf %15 : vector<16x32xf32> to vector<16x32xbf16>
      %c0_15 = arith.constant 0 : index
      %c0_16 = arith.constant 0 : index
      %17 = vector.load %arg5[%c0_15, %c0_16] : memref<32x32xbf16, #tpu.memory_space<vmem>>, vector<32x32xbf16>
      %cst_17 = arith.constant dense<0.000000e+00> : vector<16x32xf32>
      %18 = tpu.matmul %16, %17, %cst_17 {dimension_numbers = #tpu.dot_dimension_numbers<[1], [1], [0], [0], [0, 0, 1, 0], [], []>} : vector<16x32xbf16>, vector<32x32xbf16>, vector<16x32xf32> -> vector<16x32xf32>
      %19 = arith.addf %14, %18 : vector<16x32xf32>
      %c0_18 = arith.constant 0 : index
      %c0_19 = arith.constant 0 : index
      %20 = vector.load %arg6[%c0_18, %c0_19] : memref<1x32xf32, #tpu.memory_space<vmem>>, vector<1x32xf32>
      %21 = vector.broadcast %20 : vector<1x32xf32> to vector<16x32xf32>
      %22 = arith.addf %19, %21 : vector<16x32xf32>
      %c0_20 = arith.constant 0 : index
      %c0_21 = arith.constant 0 : index
      %23 = vector.load %arg10[%c0_20, %c0_21] : memref<16x32xf32, #tpu.memory_space<vmem>>, vector<16x32xf32>
      tpu.vector_store %arg10[%c0_20, %c0_21], %22 {strides = array<i32>} : memref<16x32xf32, #tpu.memory_space<vmem>>, vector<16x32xf32>,
    } else {
    }
    %c0 = arith.constant 0 : index
    %c0_1 = arith.constant 0 : index
    %3 = vector.load %arg10[%c0, %c0_1] : memref<16x32xf32, #tpu.memory_space<vmem>>, vector<16x32xf32>
    %4 = arith.truncf %3 : vector<16x32xf32> to vector<16x32xbf16>
    %c0_2 = arith.constant 0 : index
    %c0_3 = arith.constant 0 : index
    %5 = vector.load %arg7[%c0_2, %c0_3] : memref<32x256xbf16, #tpu.memory_space<vmem>>, vector<32x256xbf16>
    %cst = arith.constant dense<0.000000e+00> : vector<16x256xf32>
    %6 = tpu.matmul %4, %5, %cst {dimension_numbers = #tpu.dot_dimension_numbers<[1], [0], [0], [1], [0, 0, 1, 1], [], []>} : vector<16x32xbf16>, vector<32x256xbf16>, vector<16x256xf32> -> vector<16x256xf32>
    %c0_4 = arith.constant 0 : index
    %c0_5 = arith.constant 0 : index
    %7 = vector.load %arg8[%c0_4, %c0_5] : memref<1x256xf32, #tpu.memory_space<vmem>>, vector<1x256xf32>
    %8 = vector.broadcast %7 : vector<1x256xf32> to vector<16x256xf32>
    %9 = arith.addf %6, %8 : vector<16x256xf32>
    %c0_6 = arith.constant 0 : index
    %c0_7 = arith.constant 0 : index
    %10 = vector.load %arg9[%c0_6, %c0_7] : memref<16x256xf32, #tpu.memory_space<vmem>>, vector<16x256xf32>
    tpu.vector_store %arg9[%c0_6, %c0_7], %9 {strides = array<i32>} : memref<16x256xf32, #tpu.memory_space<vmem>>, vector<16x256xf32>,
    return
  }
  func.func @transform_0(%arg0: i32, %arg1: i32) -> (i32, i32) {
    %c0_i32 = arith.constant 0 : i32
    %c0_i32_0 = arith.constant 0 : i32
    return %arg0, %c0_i32 : i32, i32
  }
  func.func @transform_1(%arg0: i32, %arg1: i32) -> (i32, i32) {
    %c0_i32 = arith.constant 0 : i32
    %c0_i32_0 = arith.constant 0 : i32
    return %arg0, %c0_i32 : i32, i32
  }
  func.func @transform_2(%arg0: i32, %arg1: i32) -> (i32, i32) {
    %c0_i32 = arith.constant 0 : i32
    %c0_i32_0 = arith.constant 0 : i32
    %c0_i32_1 = arith.constant 0 : i32
    return %c0_i32, %c0_i32_0 : i32, i32
  }
  func.func @transform_3(%arg0: i32, %arg1: i32) -> (i32, i32) {
    %c0_i32 = arith.constant 0 : i32
    %c0_i32_0 = arith.constant 0 : i32
    %c0_i32_1 = arith.constant 0 : i32
    return %c0_i32, %c0_i32_0 : i32, i32
  }
  func.func @transform_4(%arg0: i32, %arg1: i32) -> (i32, i32) {
    %c0_i32 = arith.constant 0 : i32
    %c0_i32_0 = arith.constant 0 : i32
    %c0_i32_1 = arith.constant 0 : i32
    return %c0_i32, %c0_i32_0 : i32, i32
  }
  func.func @transform_5(%arg0: i32, %arg1: i32) -> (i32, i32) {
    %c0_i32 = arith.constant 0 : i32
    %c0_i32_0 = arith.constant 0 : i32
    return %c0_i32, %arg1 : i32, i32
  }
  func.func @transform_6(%arg0: i32, %arg1: i32) -> (i32, i32) {
    %c0_i32 = arith.constant 0 : i32
    %c0_i32_0 = arith.constant 0 : i32
    return %c0_i32, %arg1 : i32, i32
  }
  func.func @transform_7(%arg0: i32, %arg1: i32) -> (i32, i32) {
    %c0_i32 = arith.constant 0 : i32
    return %arg0, %arg1 : i32, i32
  }
}

</mosaic_0001>

<bundles_post_ra>
// kernel: bottleneck_strategy_forward.1
= control target key start
LH: loop header
LB: loop body
LE: loop exit
PB: predicated region body
PF: predicated region fallthrough
CT: control target
= control target key end

     0   :  { %v358_v1 = vmov 0.0   ;;  %vm56_vm0 = vcmask 261120   ;;  %vm359_vm1 = vmmov 0   ;;  %s467_s0 = inlined_call_operand.vmem [shape: f32[16,32], index: 0, kind: input, shape index: {}]   ;;  %s468_s1 = inlined_call_operand.vmem [shape: f32[16,32], index: 1, kind: input, shape index: {}]   ;;  %s469_s2 = inlined_call_operand.vmem [shape: bf16[32,32], index: 2, kind: input, shape index: {}]   ;;  %s470_s3 = inlined_call_operand.vmem [shape: bf16[32,32], index: 3, kind: input, shape index: {}]   ;;  %s471_s4 = inlined_call_operand.vmem [shape: f32[1,32], index: 4, kind: input, shape index: {}]   ;;  %s472_s5 = inlined_call_operand.vmem [shape: bf16[32,256], index: 5, kind: input, shape index: {}]   ;;  %s473_s6 = inlined_call_operand.vmem [shape: f32[1,256], index: 6, kind: input, shape index: {}]   ;;  %s474_s7 = inlined_call_operand.hbm [shape: f32[16,256], index: 7, kind: output, shape index: {}]  }
   0x1   :  { %v324_v0 = vld [vmem:[%s470_s3] sm:$0xff]   ;;  %302 = vmatprep.subr.bf16.mxu0 %v358_v1  ;;  %310 = vmatprep.subr.bf16.mxu1 %v358_v1  ;;  %v326_v5 = vld [vmem:[%s470_s3 + $0x8] sm:$0xff]  }
   0x2   :  { %v325_v2 = vld [vmem:[%s469_s2] sm:$0xff]   ;;  %v61_v3 = vsel %vm56_vm0, %v324_v0, 0  ;;  %v327_v6 = vld [vmem:[%s469_s2 + $0x8] sm:$0xff]   ;;  %306 = vmatprep.mubr.msk.bf16.mxu0 %vm359_vm1, %v358_v1  ;;  %314 = vmatprep.mubr.msk.bf16.mxu1 %vm359_vm1, %v358_v1 }
   0x3   :  { %303 = vmatpush3.bf16.xpose.msra.mxu0 %v61_v3  ;;  %v121_v4 = vsel %vm56_vm0, %v325_v2, 0 }
   0x4   :  { %311 = vmatpush3.bf16.xpose.msra.mxu1 %v121_v4  ;;  %304 = vmatprep.subr.bf16.mxu0 %v358_v1 }
   0x5   :  { %312 = vmatprep.subr.bf16.mxu1 %v358_v1 }
   0x6   :  { %12 = vsyncpa [#allocation4], 0  ;;  %v64_v7 = vsel %vm56_vm0, %v326_v5, 0  ;;  %v124_v8 = vsel %vm56_vm0, %v327_v6, 0  ;;  %v39_v9 = vld [vmem:[%s468_s1] sm:$0xff]  ;;  %v40_v10 = vld [vmem:[%s468_s1 + $0x8] sm:$0xff]  ;;  %v187_v36 = vlaneseq }
   0x7   :  { %v32_v11 = vld [vmem:[%s467_s0] sm:$0xff]  ;;  %v33_v12 = vld [vmem:[%s467_s0 + $0x8] sm:$0xff]  ;;  %v41_v13 = vpack.c.bf16 %v40_v10, %v39_v9  ;;  %v333_v17 = vld [vmem:[%s472_s5 + $0x14] ss:$8 sps:$4 sm:$0xff]   ;;  %v360_v18 = vmov 0   ;;  %s361_s23 = smov [#allocation3]  }
   0x8   :  { %v34_v14 = vpack.c.bf16 %v33_v12, %v32_v11  ;;  %v328_v15 = vld [vmem:[%s472_s5] ss:$8 sps:$4 sm:$0xff]   ;;  %v330_v16 = vld [vmem:[%s472_s5 + $0x4] ss:$8 sps:$4 sm:$0xff]   ;;  %v331_v19 = vld [vmem:[%s472_s5 + $0x10] ss:$8 sps:$4 sm:$0xff]  }
   0x9   :  { %v290_v22 = vld [vmem:[%s471_s4] ss:$0 sm:$0xff]  ;;  %v188_v37 = vshrl.u32 %v187_v36, 7  ;;  %s273_s24 = sshll.u32 %s361_s23, 4  ;;  %s274_s24 = int_to_ptr.vmem [resolvable:$true] %s273_s24 }
   0xa   :  { %v185_v39 = vld [vmem:[%s473_s6] sm:$0x3]  ;;  %s334_s25 = scalar_lea.vmem %s274_s24, 512  ;;  %p339_p1 = scmp.lt.s32.totalorder %s274_s24, %s274_s24 }
   0xb   :  { %305 = vmatpush3.bf16.xpose.msra.mxu0 %v64_v7  ;;  %v189_v38 = vsub.s32 0, %v188_v37  ;;  %v193_v40 = vsub.s32 1, %v188_v37  ;;  %p335_p0 = scmp.ne.s32.totalorder %s274_s24, %s334_s25  ;;  %p340_p2 = scmp.lt.s32.totalorder %s334_s25, %s334_s25 }
   0xc   :  { %313 = vmatpush3.bf16.xpose.msra.mxu1 %v124_v8  ;;  %221 = vmatprep.subr.bf16.mxu0 %v330_v16 }
   0xd   :  { %v190_v41 = vrot.slane %v185_v39, %v189_v38  ;;  %v194_v42 = vrot.slane %v185_v39, %v193_v40  ;;  %p341_p3 = por %p340_p2, %p339_p1 }
   0xf   :  { %p342_p4 = pnand %p341_p3, %p335_p0 }
  0x12   :  { %307 = vmatmul.mubr.msk.bf16.vlgmr.msra.gmra.mrb[0].mxu0 %vm56_vm0, %v41_v13 }
  0x13   :  { %315 = vmatmul.mubr.msk.bf16.vlgmr.msra.gmra.mrb[0].mxu1 %vm56_vm0, %v34_v14  ;;  %253 = vmatprep.mubr.bf16.mxu0 %v360_v18 }
  0x14   :  { %222 = vmatpush1.bf16.msra.mxu0 %v328_v15 }
  0x15   :  { %223 = vmatprep.subr.bf16.mxu0 %v333_v17 }
  0x18   :  { %224 = vmatpush1.bf16.msra.mxu0 %v331_v19 }
  0xe5   :  { %v100_v20 = vpop.f32.mrb[0].mxu0 }
  0xe6   :  { %v160_v21 = vpop.f32.mrb[0].mxu1  ;;  %v308_v23 = vpop.f32.mrb[1].mxu0 }
  0xe7   :  { %v161_v24 = vadd.f32 %v160_v21, %v100_v20  ;;  %v316_v25 = vpop.f32.mrb[1].mxu1  ;;  %v103_v26 = vpop.f32.mrb[2].mxu0 }
  0xe8   :  { %v163_v27 = vpop.f32.mrb[2].mxu1  ;;  %v309_v28 = vpop.f32.mrb[3].mxu0 }
  0xe9   :  { %v174_v29 = vadd.f32 %v290_v22, %v161_v24  ;;  %v164_v30 = vadd.f32 %v163_v27, %v103_v26  ;;  %v317_v31 = vpop.f32.mrb[3].mxu1 }
  0xeb   :  { %176 = vst.msk [vmem:[#allocation2] sm:$0xff] %vm56_vm0, %v174_v29  ;;  %v175_v32 = vadd.f32 %v290_v22, %v164_v30 }
  0xed   :  { %177 = vst.msk [vmem:[#allocation2 + $0x8] sm:$0xff] %vm56_vm0, %v175_v32 }
  0xf2   :  { %v178_v33 = vld [vmem:[#allocation2] sm:$0xff] }
  0xf4   :  { %v179_v34 = vld [vmem:[#allocation2 + $0x8] sm:$0xff] }
  0xf5   :  { %v180_v35 = vpack.c.bf16 %v179_v34, %v178_v33 }
  0xf7   :  { %295 = vmatmul.mubr.msk.bf16.vlgmr.msra.gmra.mrb[4].mxu0 %vm56_vm0, %v180_v35 }
 0x1ca   :  { %v255_v43 = vpop.f32.mrb[4].mxu0 }
 0x1cb   :  { %v256_v44 = vadd.f32 %v255_v43, %v190_v41  ;;  %v257_v45 = vpop.f32.mrb[5].mxu0 }
 0x1cc   :  { %v258_v46 = vadd.f32 %v257_v45, %v194_v42  ;;  %v259_v47 = vpop.f32.mrb[6].mxu0 }
 0x1cd   :  { %264 = vst [vmem:[#allocation3] sm:$0xff] %v256_v44  ;;  %v260_v48 = vadd.f32 %v259_v47, %v190_v41  ;;  %v261_v49 = vpop.f32.mrb[7].mxu0 }
 0x1ce   :  { %265 = vst [vmem:[#allocation3 + $0x8] sm:$0xff] %v258_v46  ;;  %v262_v50 = vadd.f32 %v261_v49, %v194_v42 }
 0x1cf   :  { %266 = vst [vmem:[#allocation3 + $0x10] sm:$0xff] %v260_v48 }
 0x1d0   :  { %267 = vst [vmem:[#allocation3 + $0x18] sm:$0xff] %v262_v50 }
 0x1d1   :  { %345 = shalt.err (!%p342_p4)
}
 0x1d2   :  { %s346_s27 = scalar_lea.hbm %s474_s7, 512 }
 0x1d3   :  { %p347_p5 = scmp.ne.s32.totalorder %s474_s7, %s346_s27  ;;  %p350_p6 = scmp.lt.u32.totalorder %s346_s27, %s474_s7 }
 0x1d5   :  { %p352_p7 = pnand %p350_p6, %p347_p5 }
 0x1d7   :  { %355 = shalt.err (!%p352_p7)
}
 0x1d8   :  { %s362_s9 = smov 256   ;;  %s363_s10 = smov 16  }
 0x1d9   :  { %279 = dma.vmem_to_hbm [thread:$0]  %s274_s24, 512, %s474_s7, [#allocation4], %s362_s9, %s362_s9, %s363_s10  }
 0x1da   :  { %356 = dma.done.wait [#allocation4], 512  }
 0x1db   :  { %357 = vsyncadd [#allocation4], 4294966784 }
 0x1dc   :  { %283 = vsyncpa [#allocation4], 1 }

</bundles_post_ra>
